<compile_context>
chip_gen: v7x
topology: tpu7x:2x2x1
jax: 0.10.0
libtpu: 0.0.40
codegen_flags: <defaults>
</compile_context>

<pallas_src>
import functools

import jax
import jax.numpy as jnp
import numpy as np
from jax.experimental import pallas as pl
from jax.experimental.pallas import tpu as pltpu

PAD = 0                                  # layer.Constants.PAD
_NBUF = 8                                # HBM-path ring depth (NBUF-1 seq steps in flight)
_MAX_GROUP = 32                          # max batch rows per grid step
_VMEM_TABLE_BYTES = 8 * 1024 * 1024      # resident-table threshold (safe on v5e/v6e/v7x)


# ----------------------------------------------------------------------------
# Fast path: embedding table resident in VMEM, gather = dynamic VMEM slice.
# ----------------------------------------------------------------------------
def _edit_encoder_vmem_kernel(tok_ref, emb_ref, out_ref, *scratch,
                              seq_len, group, fuse_acc):
    """tok_ref: SMEM (B_pad*S,) int32; emb_ref: VMEM (V, D); out_ref: VMEM (group, D)."""
    if fuse_acc:
        (rowbuf,) = scratch
        acc_ref = out_ref                      # f32 table -> accumulate straight into out
    else:
        rowbuf, acc_ref = scratch

    g = pl.program_id(0)
    base = g * (group * seq_len)               # flat token offset of this batch group

    acc_ref[...] = jnp.zeros_like(acc_ref)

    @pl.loop(0, seq_len)
    def _(s):
        # Gather one row per batch row of this group into the (group, D) staging buffer.
        for bi in range(group):                # static unroll over sublanes
            tid = tok_ref[base + bi * seq_len + s]
            rowbuf[pl.ds(bi, 1), :] = emb_ref[pl.ds(tid, 1), :]
        # One full-width, unmasked (group, D) accumulate per sequence position.
        acc_ref[...] += rowbuf[...].astype(acc_ref.dtype)

    if not fuse_acc:
        out_ref[...] = acc_ref[...].astype(out_ref.dtype)


# ----------------------------------------------------------------------------
# Large-vocab path: table stays in HBM, manual per-seq-position row-gather DMAs.
# ----------------------------------------------------------------------------
def _edit_encoder_hbm_kernel(tok_ref, emb_hbm, out_ref, *scratch,
                             seq_len, group, nbuf, fuse_acc):
    """rowbuf: VMEM (nbuf, group, D) ring; sem: DMA sems (nbuf,)."""
    if fuse_acc:
        rowbuf, sem = scratch
        acc_ref = out_ref
    else:
        rowbuf, sem, acc_ref = scratch

    g = pl.program_id(0)
    base = g * (group * seq_len)
    depth = min(nbuf - 1, seq_len)             # outstanding prefetch depth (seq steps)

    acc_ref[...] = jnp.zeros_like(acc_ref)

    def read_ids(s):
        # Plain SMEM scalar reads (callers keep these ABOVE any DMA .wait()).
        return [tok_ref[base + bi * seq_len + s] for bi in range(group)]

    def start_step(ids, slot):
        # `group` row DMAs, one per batch row, each into its own sublane of rowbuf[slot],
        # all signaling sem.at[slot] (total bytes = group * D * itemsize).
        for bi in range(group):
            pltpu.make_async_copy(
                emb_hbm.at[pl.ds(ids[bi], 1), :],
                rowbuf.at[slot, pl.ds(bi, 1), :],
                sem.at[slot],
            ).start()

    # Prime the pipeline: `depth` sequence positions in flight.
    for s in range(depth):
        start_step(read_ids(s), s % nbuf)

    @pl.loop(0, seq_len)
    def _(s):
        slot = s % nbuf

        # Hoist the SMEM reads for the next prefetch above the wait
        # (.wait() breaks SMEM sst->sld forwarding). Clamp so reads stay in range.
        s_next = jnp.minimum(s + depth, seq_len - 1)
        next_ids = read_ids(s_next)

        # Single wait covering all `group` row copies of this slot. Byte count of this
        # descriptor (group * D * itemsize) must match the copies issued in start_step.
        pltpu.make_async_copy(
            emb_hbm.at[pl.ds(0, group), :], rowbuf.at[slot], sem.at[slot],
        ).wait()

        @pl.when(s + depth < seq_len)
        def _():
            start_step(next_ids, (s + depth) % nbuf)

        # One full-width (group, D) accumulate per sequence position.
        acc_ref[...] += rowbuf[slot].astype(acc_ref.dtype)

    if not fuse_acc:
        out_ref[...] = acc_ref[...].astype(out_ref.dtype)


# ----------------------------------------------------------------------------
# Wrapper
# ----------------------------------------------------------------------------
def _pick_group(batch, max_group=_MAX_GROUP):
    """Batch rows per grid step: multiple of 8, grows with B but keeps >= 2 grid steps."""
    gb = 8
    while gb < max_group and -(-batch // (gb * 2)) >= 2:
        gb *= 2
    return gb


def edit_encoder_forward(tokens_sb, emb_table, *, nbuf=_NBUF,
                         max_table_vmem_bytes=_VMEM_TABLE_BYTES):
    """tokens_sb: (seq_len, batch) int, emb_table: (vocab, word_vec) float.

    Returns (batch, word_vec) = sum over seq of embedding lookups.
    """
    S, B = tokens_sb.shape
    V, D = emb_table.shape

    gb = _pick_group(B)
    b_pad = ((B + gb - 1) // gb) * gb          # pad batch to a multiple of gb

    # (seq, batch) -> (batch, seq) int32; clip ids so gathers stay in-bounds; padded
    # batch rows use token 0 (their outputs are sliced off below).
    tok_bs = jnp.clip(tokens_sb.astype(jnp.int32).T, 0, V - 1)
    tok_bs = jnp.pad(tok_bs, ((0, b_pad - B), (0, 0)))
    tok_flat = tok_bs.reshape(-1)

    fuse_acc = emb_table.dtype == jnp.float32
    table_bytes = V * D * emb_table.dtype.itemsize
    use_vmem_table = table_bytes <= max_table_vmem_bytes

    if use_vmem_table:
        kernel = functools.partial(_edit_encoder_vmem_kernel,
                                   seq_len=S, group=gb, fuse_acc=fuse_acc)
        in_specs = [pl.BlockSpec((V, D), lambda g, tok: (0, 0))]   # table resident in VMEM
        scratch = [pltpu.VMEM((gb, D), emb_table.dtype)]           # (group, D) row staging
    else:
        kernel = functools.partial(_edit_encoder_hbm_kernel,
                                   seq_len=S, group=gb, nbuf=nbuf, fuse_acc=fuse_acc)
        in_specs = [pl.BlockSpec(memory_space=pl.ANY)]             # table stays in HBM
        scratch = [pltpu.VMEM((nbuf, gb, D), emb_table.dtype),     # gathered-row ring
                   pltpu.SemaphoreType.DMA((nbuf,))]
    if not fuse_acc:
        scratch.append(pltpu.VMEM((gb, D), jnp.float32))           # f32 accumulator

    out = pl.pallas_call(
        kernel,
        out_shape=jax.ShapeDtypeStruct((b_pad, D), emb_table.dtype),
        grid_spec=pltpu.PrefetchScalarGridSpec(
            num_scalar_prefetch=1,                       # tokens -> SMEM
            grid=(b_pad // gb,),
            in_specs=in_specs,
            out_specs=pl.BlockSpec((gb, D), lambda g, tok: (g, 0)),
            scratch_shapes=scratch,
        ),
        compiler_params=pltpu.CompilerParams(
            dimension_semantics=("parallel",),   # batch groups independent -> megacore
            vmem_limit_bytes=32 * 1024 * 1024,
        ),
    )(tok_flat, emb_table)
    return out[:B]


def _reference(tokens_sb, emb_table):
    return jnp.sum(emb_table[tokens_sb], axis=0)


if __name__ == "__main__":
    key = jax.random.PRNGKey(0)

    # Case 1: small shapes implied by the module (vocab=dicts.size(), D=word_vec_size).
    V, D = 64, 32
    S, B = 8, 2
    k_emb, k_tok, key = jax.random.split(key, 3)
    emb_table = jax.random.normal(k_emb, (V, D), dtype=jnp.float32)
    emb_table = emb_table.at[PAD].set(0.0)          # padding_idx init semantics
    tokens = jax.random.randint(k_tok, (S, B), 0, V, dtype=jnp.int32)  # (seq, batch)

    out = jax.block_until_ready(edit_encoder_forward(tokens, emb_table))
    np.testing.assert_allclose(np.asarray(out), np.asarray(_reference(tokens, emb_table)),
                               rtol=1e-5, atol=1e-5)

    # Case 2: multiple batch groups, ragged batch, lane-dense D (VMEM-resident-table path).
    V2, D2 = 128, 128
    S2, B2 = 20, 9
    k_emb2, k_tok2, key = jax.random.split(key, 3)
    emb_table2 = jax.random.normal(k_emb2, (V2, D2), dtype=jnp.float32)
    emb_table2 = emb_table2.at[PAD].set(0.0)
    tokens2 = jax.random.randint(k_tok2, (S2, B2), 0, V2, dtype=jnp.int32)

    out2 = jax.block_until_ready(edit_encoder_forward(tokens2, emb_table2))
    np.testing.assert_allclose(np.asarray(out2), np.asarray(_reference(tokens2, emb_table2)),
                               rtol=1e-5, atol=1e-5)

    # Case 3: same data, but force the large-vocab HBM-gather path (manual DMA ring).
    out3 = jax.block_until_ready(
        edit_encoder_forward(tokens2, emb_table2, max_table_vmem_bytes=0))
    np.testing.assert_allclose(np.asarray(out3), np.asarray(_reference(tokens2, emb_table2)),
                               rtol=1e-5, atol=1e-5)

    print("KERNEL_OK")
</pallas_src>

<mosaic_0001>
module attributes {stable_mosaic.version = 11 : i64} {
  func.func @_edit_encoder_vmem_kernel(%arg0: i32, %arg1: memref<64xi32, #tpu.memory_space<smem>>, %arg2: memref<64x32xf32, #tpu.memory_space<vmem>>, %arg3: memref<8x32xf32, #tpu.memory_space<vmem>>, %arg4: memref<8x32xf32, #tpu.memory_space<vmem>>) attributes {dimension_semantics = [#tpu.dimension_semantics<parallel>], iteration_bounds = array<i64: 1>, scalar_prefetch = 1 : i64, scratch_operands = 1 : i64, tpu.core_type = #tpu.core_type<tc>, window_params = [{pipeline_mode = #tpu.pipeline_mode<synchronous>, transform_indices = @transform_0, window_bounds = array<i64: 64, 32>}, {transform_indices = @transform_1, window_bounds = array<i64: 8, 32>}]} {
    %c64_i32 = arith.constant 64 : i32
    %0 = arith.muli %arg0, %c64_i32 : i32
    %cst = arith.constant 0.000000e+00 : f32
    %1 = vector.broadcast %cst : f32 to vector<8x32xf32>
    %c0 = arith.constant 0 : index
    %c0_0 = arith.constant 0 : index
    %2 = vector.load %arg3[%c0, %c0_0] : memref<8x32xf32, #tpu.memory_space<vmem>>, vector<8x32xf32>
    tpu.vector_store %arg3[%c0, %c0_0], %1 {strides = array<i32>} : memref<8x32xf32, #tpu.memory_space<vmem>>, vector<8x32xf32>,
    %c0_i32 = arith.constant 0 : i32
    %c8_i32 = arith.constant 8 : i32
    %3 = arith.addi %c0_i32, %c8_i32 : i32
    %c1_i32 = arith.constant 1 : i32
    scf.for %arg5 = %c0_i32 to %3 step %c1_i32  : i32 {
      %c1_i32_2 = arith.constant 1 : i32
      %4 = arith.muli %arg5, %c1_i32_2 : i32
      %c0_i32_3 = arith.constant 0 : i32
      %5 = arith.addi %c0_i32_3, %4 : i32
      %c0_i32_4 = arith.constant 0 : i32
      %6 = arith.addi %0, %c0_i32_4 : i32
      %7 = arith.addi %6, %5 : i32
      %8 = arith.index_cast %7 : i32 to index
      %9 = memref.load %arg1[%8] : memref<64xi32, #tpu.memory_space<smem>>
      %10 = arith.index_cast %9 : i32 to index
      %c0_5 = arith.constant 0 : index
      %11 = vector.load %arg2[%10, %c0_5] : memref<64x32xf32, #tpu.memory_space<vmem>>, vector<1x32xf32>
      %c0_6 = arith.constant 0 : index
      %c0_7 = arith.constant 0 : index
      %12 = vector.load %arg4[%c0_6, %c0_7] : memref<8x32xf32, #tpu.memory_space<vmem>>, vector<1x32xf32>
      tpu.vector_store %arg4[%c0_6, %c0_7], %11 {strides = array<i32>} : memref<8x32xf32, #tpu.memory_space<vmem>>, vector<1x32xf32>,
      %c8_i32_8 = arith.constant 8 : i32
      %13 = arith.addi %0, %c8_i32_8 : i32
      %14 = arith.addi %13, %5 : i32
      %15 = arith.index_cast %14 : i32 to index
      %16 = memref.load %arg1[%15] : memref<64xi32, #tpu.memory_space<smem>>
      %17 = arith.index_cast %16 : i32 to index
      %c0_9 = arith.constant 0 : index
      %18 = vector.load %arg2[%17, %c0_9] : memref<64x32xf32, #tpu.memory_space<vmem>>, vector<1x32xf32>
      %c1 = arith.constant 1 : index
      %c0_10 = arith.constant 0 : index
      %19 = vector.load %arg4[%c1, %c0_10] : memref<8x32xf32, #tpu.memory_space<vmem>>, vector<1x32xf32>
      tpu.vector_store %arg4[%c1, %c0_10], %18 {strides = array<i32>} : memref<8x32xf32, #tpu.memory_space<vmem>>, vector<1x32xf32>,
      %c16_i32 = arith.constant 16 : i32
      %20 = arith.addi %0, %c16_i32 : i32
      %21 = arith.addi %20, %5 : i32
      %22 = arith.index_cast %21 : i32 to index
      %23 = memref.load %arg1[%22] : memref<64xi32, #tpu.memory_space<smem>>
      %24 = arith.index_cast %23 : i32 to index
      %c0_11 = arith.constant 0 : index
      %25 = vector.load %arg2[%24, %c0_11] : memref<64x32xf32, #tpu.memory_space<vmem>>, vector<1x32xf32>
      %c2 = arith.constant 2 : index
      %c0_12 = arith.constant 0 : index
      %26 = vector.load %arg4[%c2, %c0_12] : memref<8x32xf32, #tpu.memory_space<vmem>>, vector<1x32xf32>
      tpu.vector_store %arg4[%c2, %c0_12], %25 {strides = array<i32>} : memref<8x32xf32, #tpu.memory_space<vmem>>, vector<1x32xf32>,
      %c24_i32 = arith.constant 24 : i32
      %27 = arith.addi %0, %c24_i32 : i32
      %28 = arith.addi %27, %5 : i32
      %29 = arith.index_cast %28 : i32 to index
      %30 = memref.load %arg1[%29] : memref<64xi32, #tpu.memory_space<smem>>
      %31 = arith.index_cast %30 : i32 to index
      %c0_13 = arith.constant 0 : index
      %32 = vector.load %arg2[%31, %c0_13] : memref<64x32xf32, #tpu.memory_space<vmem>>, vector<1x32xf32>
      %c3 = arith.constant 3 : index
      %c0_14 = arith.constant 0 : index
      %33 = vector.load %arg4[%c3, %c0_14] : memref<8x32xf32, #tpu.memory_space<vmem>>, vector<1x32xf32>
      tpu.vector_store %arg4[%c3, %c0_14], %32 {strides = array<i32>} : memref<8x32xf32, #tpu.memory_space<vmem>>, vector<1x32xf32>,
      %c32_i32 = arith.constant 32 : i32
      %34 = arith.addi %0, %c32_i32 : i32
      %35 = arith.addi %34, %5 : i32
      %36 = arith.index_cast %35 : i32 to index
      %37 = memref.load %arg1[%36] : memref<64xi32, #tpu.memory_space<smem>>
      %38 = arith.index_cast %37 : i32 to index
      %c0_15 = arith.constant 0 : index
      %39 = vector.load %arg2[%38, %c0_15] : memref<64x32xf32, #tpu.memory_space<vmem>>, vector<1x32xf32>
      %c4 = arith.constant 4 : index
      %c0_16 = arith.constant 0 : index
      %40 = vector.load %arg4[%c4, %c0_16] : memref<8x32xf32, #tpu.memory_space<vmem>>, vector<1x32xf32>
      tpu.vector_store %arg4[%c4, %c0_16], %39 {strides = array<i32>} : memref<8x32xf32, #tpu.memory_space<vmem>>, vector<1x32xf32>,
      %c40_i32 = arith.constant 40 : i32
      %41 = arith.addi %0, %c40_i32 : i32
      %42 = arith.addi %41, %5 : i32
      %43 = arith.index_cast %42 : i32 to index
      %44 = memref.load %arg1[%43] : memref<64xi32, #tpu.memory_space<smem>>
      %45 = arith.index_cast %44 : i32 to index
      %c0_17 = arith.constant 0 : index
      %46 = vector.load %arg2[%45, %c0_17] : memref<64x32xf32, #tpu.memory_space<vmem>>, vector<1x32xf32>
      %c5 = arith.constant 5 : index
      %c0_18 = arith.constant 0 : index
      %47 = vector.load %arg4[%c5, %c0_18] : memref<8x32xf32, #tpu.memory_space<vmem>>, vector<1x32xf32>
      tpu.vector_store %arg4[%c5, %c0_18], %46 {strides = array<i32>} : memref<8x32xf32, #tpu.memory_space<vmem>>, vector<1x32xf32>,
      %c48_i32 = arith.constant 48 : i32
      %48 = arith.addi %0, %c48_i32 : i32
      %49 = arith.addi %48, %5 : i32
      %50 = arith.index_cast %49 : i32 to index
      %51 = memref.load %arg1[%50] : memref<64xi32, #tpu.memory_space<smem>>
      %52 = arith.index_cast %51 : i32 to index
      %c0_19 = arith.constant 0 : index
      %53 = vector.load %arg2[%52, %c0_19] : memref<64x32xf32, #tpu.memory_space<vmem>>, vector<1x32xf32>
      %c6 = arith.constant 6 : index
      %c0_20 = arith.constant 0 : index
      %54 = vector.load %arg4[%c6, %c0_20] : memref<8x32xf32, #tpu.memory_space<vmem>>, vector<1x32xf32>
      tpu.vector_store %arg4[%c6, %c0_20], %53 {strides = array<i32>} : memref<8x32xf32, #tpu.memory_space<vmem>>, vector<1x32xf32>,
      %c56_i32 = arith.constant 56 : i32
      %55 = arith.addi %0, %c56_i32 : i32
      %56 = arith.addi %55, %5 : i32
      %57 = arith.index_cast %56 : i32 to index
      %58 = memref.load %arg1[%57] : memref<64xi32, #tpu.memory_space<smem>>
      %59 = arith.index_cast %58 : i32 to index
      %c0_21 = arith.constant 0 : index
      %60 = vector.load %arg2[%59, %c0_21] : memref<64x32xf32, #tpu.memory_space<vmem>>, vector<1x32xf32>
      %c7 = arith.constant 7 : index
      %c0_22 = arith.constant 0 : index
      %61 = vector.load %arg4[%c7, %c0_22] : memref<8x32xf32, #tpu.memory_space<vmem>>, vector<1x32xf32>
      tpu.vector_store %arg4[%c7, %c0_22], %60 {strides = array<i32>} : memref<8x32xf32, #tpu.memory_space<vmem>>, vector<1x32xf32>,
      %c0_23 = arith.constant 0 : index
      %c0_24 = arith.constant 0 : index
      %62 = vector.load %arg3[%c0_23, %c0_24] : memref<8x32xf32, #tpu.memory_space<vmem>>, vector<8x32xf32>
      %c0_25 = arith.constant 0 : index
      %c0_26 = arith.constant 0 : index
      %63 = vector.load %arg4[%c0_25, %c0_26] : memref<8x32xf32, #tpu.memory_space<vmem>>, vector<8x32xf32>
      %64 = arith.addf %62, %63 : vector<8x32xf32>
      %c0_27 = arith.constant 0 : index
      %c0_28 = arith.constant 0 : index
      %65 = vector.load %arg3[%c0_27, %c0_28] : memref<8x32xf32, #tpu.memory_space<vmem>>, vector<8x32xf32>
      tpu.vector_store %arg3[%c0_27, %c0_28], %64 {strides = array<i32>} : memref<8x32xf32, #tpu.memory_space<vmem>>, vector<8x32xf32>,
    }
    %c8_i32_1 = arith.constant 8 : i32
    return
  }
  func.func @transform_0(%arg0: i32, %arg1: memref<64xi32, #tpu.memory_space<smem>>) -> (i32, i32) {
    %c0_i32 = arith.constant 0 : i32
    %c0_i32_0 = arith.constant 0 : i32
    %c0_i32_1 = arith.constant 0 : i32
    return %c0_i32, %c0_i32_0 : i32, i32
  }
  func.func @transform_1(%arg0: i32, %arg1: memref<64xi32, #tpu.memory_space<smem>>) -> (i32, i32) {
    %c0_i32 = arith.constant 0 : i32
    %c0_i32_0 = arith.constant 0 : i32
    return %arg0, %c0_i32 : i32, i32
  }
}

</mosaic_0001>

<bundles_post_ra>
// kernel: tpu_custom_call.1
= control target key start
LH: loop header
LB: loop body
LE: loop exit
PB: predicated region body
PF: predicated region fallthrough
CT: control target
= control target key end

     0   :  { %s244_s0 = inlined_call_operand.vmem [shape: s32[64], index: 0, kind: input, shape index: {}]   ;;  %s245_s1 = inlined_call_operand.vmem [shape: f32[64,32], index: 1, kind: input, shape index: {}]   ;;  %s246_s2 = inlined_call_operand.hbm [shape: f32[8,32], index: 2, kind: output, shape index: {}]  }
   0x1   :  { %s7_s11 = sshll.u32 %s244_s0, 4  ;;  %s8_s11 = int_to_ptr.vmem [resolvable:$true] %s7_s11 }
   0x2   :  { %s115_s12 = scalar_lea.vmem %s8_s11, 16  ;;  %p120_p1 = scmp.lt.s32.totalorder %s8_s11, %s8_s11 }
   0x3   :  { %p116_p0 = scmp.ne.s32.totalorder %s8_s11, %s115_s12  ;;  %p121_p2 = scmp.lt.s32.totalorder %s115_s12, %s115_s12 }
   0x5   :  { %p122_p3 = por %p121_p2, %p120_p1 }
   0x7   :  { %p123_p4 = pnand %p122_p3, %p116_p0 }
   0x9   :  { %126 = shalt.err (!%p123_p4)  }
   0xa   :  { %s161_s13 = smov [#allocation4]  }
   0xb   :  { %10 = dma.vmem_to_smem %s8_s11, 16, %s161_s13, [#allocation3] }
   0xc   :  { %153 = dma.done.wait [#allocation3], 16 }
   0xd   :  { %154 = vsyncadd [#allocation3], 4294967280 }
   0xe   :  { %12 = sfence }
   0xf   :  { %13 = vsyncpa [#allocation6], 0  ;;  %vm17_vm0 = vcmask 261120   ;;  %v162_v0 = vmov 0.0   ;;  %s183_s14 = smov 0  }
  0x10   :  { %18 = vst.msk [vmem:[#allocation5] sm:$0xff] %vm17_vm0, %v162_v0 }
  0x11 LB: > { %s26_s0 = sld [smem:[#allocation4 + %s159_s14]]  ;;  %s32_s15 = sadd.s32 8, %s159_s14  ;;  %vm29_vm1 = vcmask 253952   ;;  %s159_s14 = sphi %s183_s14, %s24_s14  }
  0x12   : > { %s33_s16 = sld [smem:[#allocation4 + %s32_s15]]  ;;  %s38_s17 = sadd.s32 16, %s159_s14 }
  0x13   : > { %s39_s18 = sld [smem:[#allocation4 + %s38_s17]]  ;;  %s44_s19 = sadd.s32 24, %s159_s14 }
  0x14   : > { %s45_s20 = sld [smem:[#allocation4 + %s44_s19]]  ;;  %s50_s21 = sadd.s32 32, %s159_s14 }
  0x15   : > { %s51_s22 = sld [smem:[#allocation4 + %s50_s21]]  ;;  %s56_s23 = sadd.s32 40, %s159_s14 }
  0x16   : > { %s57_s24 = sld [smem:[#allocation4 + %s56_s23]]  ;;  %s62_s25 = sadd.s32 48, %s159_s14 }
  0x17   : > { %s27_s28 = scalar_lea.vmem %s245_s1, %s26_s0  ;;  %s63_s29 = sld [smem:[#allocation4 + %s62_s25]]  ;;  %v73_v9 = vld [vmem:[#allocation5] sm:$0xff] }
  0x18   : > { %v28_v1 = vld [vmem:[%s27_s28] sm:$0x1]  ;;  %s34_s4 = scalar_lea.vmem %s245_s1, %s33_s16  ;;  %s68_s5 = sadd.s32 56, %s159_s14 }
  0x19   : > { %30 = vst.msk [vmem:[#allocation2] sm:$0x1] %vm29_vm1, %v28_v1  ;;  %v35_v2 = vld [vmem:[%s34_s4] sm:$0x1]  ;;  %s40_s8 = scalar_lea.vmem %s245_s1, %s39_s18  ;;  %s69_s9 = sld [smem:[#allocation4 + %s68_s5]] }
  0x1a   : > { %36 = vst.msk [vmem:[#allocation2 + $0x1] sm:$0x1] %vm29_vm1, %v35_v2  ;;  %v41_v3 = vld [vmem:[%s40_s8] sm:$0x1]  ;;  %s46_s12 = scalar_lea.vmem %s245_s1, %s45_s20  ;;  %s24_s14 = sadd.s32 1, %s159_s14  }
  0x1b   : > { %42 = vst.msk [vmem:[#allocation2 + $0x2] sm:$0x1] %vm29_vm1, %v41_v3  ;;  %v47_v4 = vld [vmem:[%s46_s12] sm:$0x1]  ;;  %s52_s15 = scalar_lea.vmem %s245_s1, %s51_s22  ;;  %p21_p5 = scmp.ge.s32.totalorder %s24_s14, 8  }
  0x1c   : > { %48 = vst.msk [vmem:[#allocation2 + $0x3] sm:$0x1] %vm29_vm1, %v47_v4  ;;  %v53_v5 = vld [vmem:[%s52_s15] sm:$0x1]  ;;  %s58_s18 = scalar_lea.vmem %s245_s1, %s57_s24  ;;  %s163_s24 = smov (%p21_p5), [#allocation5]  }
  0x1d   : > { %54 = vst.msk [vmem:[#allocation2 + $0x4] sm:$0x1] %vm29_vm1, %v53_v5  ;;  %v59_v6 = vld [vmem:[%s58_s18] sm:$0x1]  ;;  %s64_s20 = scalar_lea.vmem %s245_s1, %s63_s29  ;;  %s83_s26 = sshll.u32 (%p21_p5), %s163_s24, 4  ;;  %s84_s26 = int_to_ptr.vmem [resolvable:$true] %s83_s26 }
  0x1e   : > { %60 = vst.msk [vmem:[#allocation2 + $0x5] sm:$0x1] %vm29_vm1, %v59_v6  ;;  %v65_v7 = vld [vmem:[%s64_s20] sm:$0x1]  ;;  %s127_s27 = scalar_lea.vmem (%p21_p5), %s84_s26, 128  ;;  %p132_p7 = scmp.lt.s32.totalorder (%p21_p5), %s84_s26, %s84_s26 }
  0x1f   : > { %66 = vst.msk [vmem:[#allocation2 + $0x6] sm:$0x1] %vm29_vm1, %v65_v7  ;;  %s70_s25 = scalar_lea.vmem %s245_s1, %s69_s9  ;;  %p128_p6 = scmp.ne.s32.totalorder (%p21_p5), %s84_s26, %s127_s27 }
  0x20   : > { %v71_v8 = vld [vmem:[%s70_s25] sm:$0x1]  ;;  %p133_p8 = scmp.lt.s32.totalorder (%p21_p5), %s127_s27, %s127_s27 }
  0x21   : > { %72 = vst.msk [vmem:[#allocation2 + $0x7] sm:$0x1] %vm29_vm1, %v71_v8 }
  0x22   :  { %p134_p9 = por (%p21_p5), %p133_p8, %p132_p7 }
  0x24   :  { %p135_p10 = pnand (%p21_p5), %p134_p9, %p128_p6 }
  0x25   :  { %23 = sbr.rel (!%p21_p5) target bundleno = 17 (0x11), region = 39 }
  0x28   : > { %v74_v10 = vld [vmem:[#allocation2] sm:$0xff] }
  0x29   : > { %v75_v11 = vadd.f32 %v74_v10, %v73_v9 }
  0x2b   : > { %76 = vst.msk [vmem:[#allocation5] sm:$0xff] %vm17_vm0, %v75_v11 }
  0x2c   :  { %138 = shalt.err (!%p135_p10)
}
  0x2d   :  { %s139_s30 = scalar_lea.hbm %s246_s2, 128 }
  0x2e   :  { %p140_p11 = scmp.ne.s32.totalorder %s246_s2, %s139_s30  ;;  %p143_p12 = scmp.lt.u32.totalorder %s139_s30, %s246_s2 }
  0x30   :  { %p145_p13 = pnand %p143_p12, %p140_p11 }
  0x32   :  { %148 = shalt.err (!%p145_p13)
}
  0x33   :  { %86 = dma.vmem_to_hbm [thread:$0]  %s84_s26, 128, %s246_s2, [#allocation6]  }
  0x34   :  { %155 = dma.done.wait [#allocation6], 128  }
  0x35   :  { %156 = vsyncadd [#allocation6], 4294967168 }
  0x36   :  { %90 = vsyncpa [#allocation6], 1 }

</bundles_post_ra>
